<compile_context>
chip_gen: v7x
topology: tpu7x:2x2x1
jax: 0.10.0
libtpu: 0.0.40
codegen_flags: <defaults>
</compile_context>

<pallas_src>
import functools

import jax
import jax.numpy as jnp
from jax.experimental import pallas as pl
from jax.experimental.pallas import tpu as pltpu


def _round_up(x, m):
    return ((x + m - 1) // m) * m


def _silu(h):
    # SiLU(h) = h * sigmoid(h), sigmoid(h) = 0.5 * (1 + tanh(0.5 * h)).
    # One EUP push (tanh) + two cheap VPU ops; numerically safe (tanh
    # saturates, no exp overflow, no approximate reciprocal).
    return h * (0.5 * jnp.tanh(0.5 * h) + 0.5)


def mlp_kernel(x_ref, w1_ref, b1_ref, w2_ref, b2_ref, w3_ref, b3_ref, o_ref):
    """Fused fc1 -> SiLU -> fc2 -> SiLU -> fc3 on one (tile_m, *) batch tile."""
    w_dtype = w1_ref.dtype

    # fc1 + SiLU (MXU accumulates in f32; biases are pre-cast to f32).
    h = jnp.dot(x_ref[...], w1_ref[...], preferred_element_type=jnp.float32)
    h = _silu(h + b1_ref[...])

    # fc2 + SiLU
    h = jnp.dot(h.astype(w_dtype), w2_ref[...], preferred_element_type=jnp.float32)
    h = _silu(h + b2_ref[...])

    # fc3 (no activation)
    out = jnp.dot(h.astype(w_dtype), w3_ref[...], preferred_element_type=jnp.float32)
    o_ref[...] = (out + b3_ref[...]).astype(o_ref.dtype)


@functools.lru_cache(maxsize=None)
def _vmem_capacity_bytes():
    try:
        return int(pltpu.get_tpu_info().vmem_capacity_bytes)
    except Exception:
        return 64 * 1024 * 1024  # conservative: v7x per-TC VMEM


@functools.lru_cache(maxsize=None)
def _single_buffer_supported():
    """One-time probe: can grid-invariant inputs use pipeline_mode=pl.Buffered(1)?"""
    def _copy(x_ref, o_ref):
        o_ref[...] = x_ref[...]

    try:
        f = pl.pallas_call(
            _copy,
            out_shape=jax.ShapeDtypeStruct((16, 128), jnp.float32),
            grid=(2,),
            in_specs=[pl.BlockSpec((8, 128), lambda i: (0, 0),
                                   pipeline_mode=pl.Buffered(1))],
            out_specs=pl.BlockSpec((8, 128), lambda i: (i, 0)),
        )
        jax.jit(f).lower(jnp.zeros((8, 128), jnp.float32)).compile()
        return True
    except Exception:
        return False


@functools.partial(
    jax.jit,
    static_argnames=("tile_m", "out_size", "single_buffer", "vmem_limit_bytes"))
def _mlp_forward_impl(x, w1p, b1p, w2p, b2p, w3p, b3p, *, tile_m, out_size,
                      single_buffer, vmem_limit_bytes):
    B, in_size = x.shape
    in_p, h1_p = w1p.shape
    h2_p = w2p.shape[1]
    out_p = w3p.shape[1]
    w_dtype = w1p.dtype
    out_dtype = x.dtype

    B_pad = _round_up(B, tile_m)
    xp = jnp.pad(x.astype(w_dtype), ((0, B_pad - B), (0, in_p - in_size)))

    def wspec(shape):
        # Grid-invariant weights/biases: constant index map; single-buffered
        # when supported so VMEM is not spent double-buffering static data.
        if single_buffer:
            return pl.BlockSpec(shape, lambda i: (0, 0),
                                pipeline_mode=pl.Buffered(1))
        return pl.BlockSpec(shape, lambda i: (0, 0))

    w_bytes = int((w1p.size + w2p.size + w3p.size) * w1p.dtype.itemsize
                  + (b1p.size + b2p.size + b3p.size) * b1p.dtype.itemsize)
    cost = pl.CostEstimate(
        flops=2 * B_pad * (in_p * h1_p + h1_p * h2_p + h2_p * out_p),
        transcendentals=B_pad * (h1_p + h2_p),       # one tanh per hidden elem
        bytes_accessed=int(xp.size * xp.dtype.itemsize) + w_bytes
        + int(B_pad * out_p * jnp.dtype(out_dtype).itemsize),
    )

    out = pl.pallas_call(
        mlp_kernel,
        out_shape=jax.ShapeDtypeStruct((B_pad, out_p), out_dtype),
        grid_spec=pltpu.PrefetchScalarGridSpec(
            num_scalar_prefetch=0,
            grid=(B_pad // tile_m,),
            in_specs=[
                pl.BlockSpec((tile_m, in_p), lambda i: (i, 0)),   # x tile
                wspec((in_p, h1_p)),                              # w1
                wspec((1, h1_p)),                                 # b1 (f32)
                wspec((h1_p, h2_p)),                              # w2
                wspec((1, h2_p)),                                 # b2 (f32)
                wspec((h2_p, out_p)),                             # w3
                wspec((1, out_p)),                                # b3 (f32)
            ],
            out_specs=pl.BlockSpec((tile_m, out_p), lambda i: (i, 0)),
        ),
        compiler_params=pltpu.CompilerParams(
            dimension_semantics=("parallel",),   # batch steps shard across TCs
            vmem_limit_bytes=vmem_limit_bytes,
        ),
        cost_estimate=cost,
    )(xp, w1p, b1p, w2p, b2p, w3p, b3p)

    return out[:B, :out_size]


class PallasMLP:
    """MLP(fc1 -> SiLU -> fc2 -> SiLU -> fc3) with params padded/cast once.

    Weights are (in, out) = torch weight.T; biases are (out,) or (1, out).
    Zero padding is exact: padded weight rows/cols and bias lanes are 0 and
    SiLU(0) == 0, so padded lanes never contribute; padded output columns
    are sliced off.
    """

    def __init__(self, w1, b1, w2, b2, w3, b3):
        self.in_size, self.h1 = w1.shape
        self.h2 = w2.shape[1]
        self.out_size = w3.shape[1]
        self.w_dtype = jnp.dtype(w1.dtype)

        self.in_p = _round_up(self.in_size, 128)
        self.h1_p = _round_up(self.h1, 128)
        self.h2_p = _round_up(self.h2, 128)
        self.out_p = _round_up(self.out_size, 128)

        def pad_w(w, rp, cp):
            return jnp.pad(w, ((0, rp - w.shape[0]), (0, cp - w.shape[1])))

        def pad_b(b, cp):
            b = jnp.asarray(b, jnp.float32).reshape(1, -1)   # pre-cast to f32
            return jnp.pad(b, ((0, 0), (0, cp - b.shape[1])))

        # Padded/cast once; reused on every forward call.
        self.params = (
            pad_w(w1, self.in_p, self.h1_p), pad_b(b1, self.h1_p),
            pad_w(w2, self.h1_p, self.h2_p), pad_b(b2, self.h2_p),
            pad_w(w3, self.h2_p, self.out_p), pad_b(b3, self.out_p),
        )
        self.w_bytes = int(sum(int(p.size) * p.dtype.itemsize for p in self.params))

        # bf16 packs two rows per sublane -> 16-row batch granularity.
        self.sublane = 16 if self.w_dtype == jnp.bfloat16 else 8
        self.single_buffer = _single_buffer_supported()

    def _resident_bytes(self, tile_m):
        w_itemsize = self.w_dtype.itemsize
        return int(self.w_bytes * (1 if self.single_buffer else 2)
                   + 2 * tile_m * self.in_p * w_itemsize     # x double buffer
                   + 2 * tile_m * self.out_p * 4             # out double buffer
                   + 4 * tile_m * (self.h1_p + self.h2_p) * 4)  # f32 intermediates

    def _choose_tile_m(self, B):
        sub = self.sublane
        tile = sub
        # Largest batch tile with <= ~12.5% zero-padding waste.
        for cand in (512, 256, 128, 64, 32, 16, 8):
            if cand < sub:
                continue
            b_pad = _round_up(B, cand)
            if (b_pad - B) / b_pad <= 0.125:
                tile = cand
                break
        # Give the grid >= 2 "parallel" steps so the batch axis can shard
        # across both TensorCores on v7x.
        if _round_up(B, tile) // tile == 1 and B >= 2 * sub:
            tile = max(sub, _round_up(tile // 2, sub))
        # Shrink if the resident footprint would not fit in this chip's VMEM.
        budget = int(0.85 * _vmem_capacity_bytes())
        while tile > sub and self._resident_bytes(tile) > budget:
            tile = max(sub, _round_up(tile // 2, sub))
        return tile

    def __call__(self, x):
        B = x.shape[0]
        tile_m = self._choose_tile_m(B)
        resident = self._resident_bytes(tile_m)
        if resident <= 32 * 1024 * 1024:
            vmem_limit = None                       # scoped default is enough
        else:
            vmem_limit = min(int(resident * 1.25),
                             int(0.85 * _vmem_capacity_bytes()))
        # TODO(synk): if the padded weights alone exceed the VMEM budget
        # (very wide hidden layers on v7x's 64 MiB), add a second grid axis
        # that N-tiles h1/h2 with an f32 accumulator instead of keeping all
        # three weights resident.
        return _mlp_forward_impl(x, *self.params, tile_m=tile_m,
                                 out_size=self.out_size,
                                 single_buffer=self.single_buffer,
                                 vmem_limit_bytes=vmem_limit)


def init_params(key, input_size, hidden_size1, hidden_size2, output_size):
    """Deterministic init mimicking nn.Linear's uniform(-1/sqrt(in), 1/sqrt(in))."""
    ks = jax.random.split(key, 6)

    def linear(kw, kb, fan_in, fan_out):
        bound = 1.0 / jnp.sqrt(fan_in)
        w = jax.random.uniform(kw, (fan_in, fan_out), jnp.float32, -bound, bound)
        b = jax.random.uniform(kb, (1, fan_out), jnp.float32, -bound, bound)
        return w, b

    w1, b1 = linear(ks[0], ks[1], input_size, hidden_size1)
    w2, b2 = linear(ks[2], ks[3], hidden_size1, hidden_size2)
    w3, b3 = linear(ks[4], ks[5], hidden_size2, output_size)
    return w1, b1, w2, b2, w3, b3


def mlp_reference(x, w1, b1, w2, b2, w3, b3):
    h = jax.nn.silu(x @ w1 + b1)
    h = jax.nn.silu(h @ w2 + b2)
    return h @ w3 + b3


if __name__ == "__main__":
    key = jax.random.PRNGKey(0)
    k_in, k_params = jax.random.split(key)

    batch = 16
    input_size, hidden1, hidden2, output_size = 32, 64, 48, 8

    x = jax.random.normal(k_in, (batch, input_size), jnp.float32)
    params = init_params(k_params, input_size, hidden1, hidden2, output_size)
    ref = mlp_reference(x, *params)

    # f32 weights / activations.
    mlp_f32 = PallasMLP(*params)
    out_f32 = jax.block_until_ready(mlp_f32(x))
    assert out_f32.shape == (batch, output_size)
    assert jnp.allclose(out_f32, ref, atol=1e-2, rtol=1e-2), "f32 mismatch vs reference"

    # bf16 weights / activations (MXU-native), f32 accumulation + f32 biases.
    w1, b1, w2, b2, w3, b3 = params
    mlp_bf16 = PallasMLP(w1.astype(jnp.bfloat16), b1,
                         w2.astype(jnp.bfloat16), b2,
                         w3.astype(jnp.bfloat16), b3)
    out_bf16 = jax.block_until_ready(mlp_bf16(x.astype(jnp.bfloat16)))
    assert out_bf16.shape == (batch, output_size)
    assert jnp.allclose(out_bf16.astype(jnp.float32), ref, atol=1e-1, rtol=1e-1), \
        "bf16 mismatch vs reference"

    print("KERNEL_OK")
</pallas_src>

<mosaic_0001>
module attributes {stable_mosaic.version = 11 : i64} {
  func.func @mlp_kernel(%arg0: i32, %arg1: memref<8x128xf32, #tpu.memory_space<vmem>>, %arg2: memref<128x128xf32, #tpu.memory_space<vmem>>, %arg3: memref<1x128xf32, #tpu.memory_space<vmem>>, %arg4: memref<128x128xf32, #tpu.memory_space<vmem>>, %arg5: memref<1x128xf32, #tpu.memory_space<vmem>>, %arg6: memref<128x128xf32, #tpu.memory_space<vmem>>, %arg7: memref<1x128xf32, #tpu.memory_space<vmem>>, %arg8: memref<8x128xf32, #tpu.memory_space<vmem>>) attributes {dimension_semantics = [#tpu.dimension_semantics<parallel>], iteration_bounds = array<i64: 2>, scalar_prefetch = 0 : i64, scratch_operands = 0 : i64, tpu.core_type = #tpu.core_type<tc>, window_params = [{transform_indices = @transform_0, window_bounds = array<i64: 8, 128>}, {pipeline_mode = #tpu.pipeline_mode<synchronous>, transform_indices = @transform_1, window_bounds = array<i64: 128, 128>}, {pipeline_mode = #tpu.pipeline_mode<synchronous>, transform_indices = @transform_2, window_bounds = array<i64: 1, 128>}, {pipeline_mode = #tpu.pipeline_mode<synchronous>, transform_indices = @transform_3, window_bounds = array<i64: 128, 128>}, {pipeline_mode = #tpu.pipeline_mode<synchronous>, transform_indices = @transform_4, window_bounds = array<i64: 1, 128>}, {pipeline_mode = #tpu.pipeline_mode<synchronous>, transform_indices = @transform_5, window_bounds = array<i64: 128, 128>}, {pipeline_mode = #tpu.pipeline_mode<synchronous>, transform_indices = @transform_6, window_bounds = array<i64: 1, 128>}, {transform_indices = @transform_7, window_bounds = array<i64: 8, 128>}]} {
    %c0 = arith.constant 0 : index
    %c0_0 = arith.constant 0 : index
    %0 = vector.load %arg1[%c0, %c0_0] : memref<8x128xf32, #tpu.memory_space<vmem>>, vector<8x128xf32>
    %c0_1 = arith.constant 0 : index
    %c0_2 = arith.constant 0 : index
    %1 = vector.load %arg2[%c0_1, %c0_2] : memref<128x128xf32, #tpu.memory_space<vmem>>, vector<128x128xf32>
    %cst = arith.constant dense<0.000000e+00> : vector<8x128xf32>
    %2 = tpu.matmul %0, %1, %cst {dimension_numbers = #tpu.dot_dimension_numbers<[1], [0], [0], [1], [0, 0, 1, 1], [], []>} : vector<8x128xf32>, vector<128x128xf32>, vector<8x128xf32> -> vector<8x128xf32>
    %c0_3 = arith.constant 0 : index
    %c0_4 = arith.constant 0 : index
    %3 = vector.load %arg3[%c0_3, %c0_4] : memref<1x128xf32, #tpu.memory_space<vmem>>, vector<1x128xf32>
    %4 = vector.broadcast %3 : vector<1x128xf32> to vector<8x128xf32>
    %5 = arith.addf %2, %4 : vector<8x128xf32>
    %cst_5 = arith.constant 5.000000e-01 : f32
    %6 = vector.broadcast %cst_5 : f32 to vector<8x128xf32>
    %7 = arith.mulf %6, %5 : vector<8x128xf32>
    %8 = math.tanh %7 : vector<8x128xf32>
    %cst_6 = arith.constant 5.000000e-01 : f32
    %9 = vector.broadcast %cst_6 : f32 to vector<8x128xf32>
    %10 = arith.mulf %9, %8 : vector<8x128xf32>
    %cst_7 = arith.constant 5.000000e-01 : f32
    %11 = vector.broadcast %cst_7 : f32 to vector<8x128xf32>
    %12 = arith.addf %10, %11 : vector<8x128xf32>
    %13 = arith.mulf %5, %12 : vector<8x128xf32>
    %c0_8 = arith.constant 0 : index
    %c0_9 = arith.constant 0 : index
    %14 = vector.load %arg4[%c0_8, %c0_9] : memref<128x128xf32, #tpu.memory_space<vmem>>, vector<128x128xf32>
    %cst_10 = arith.constant dense<0.000000e+00> : vector<8x128xf32>
    %15 = tpu.matmul %13, %14, %cst_10 {dimension_numbers = #tpu.dot_dimension_numbers<[1], [0], [0], [1], [0, 0, 1, 1], [], []>} : vector<8x128xf32>, vector<128x128xf32>, vector<8x128xf32> -> vector<8x128xf32>
    %c0_11 = arith.constant 0 : index
    %c0_12 = arith.constant 0 : index
    %16 = vector.load %arg5[%c0_11, %c0_12] : memref<1x128xf32, #tpu.memory_space<vmem>>, vector<1x128xf32>
    %17 = vector.broadcast %16 : vector<1x128xf32> to vector<8x128xf32>
    %18 = arith.addf %15, %17 : vector<8x128xf32>
    %cst_13 = arith.constant 5.000000e-01 : f32
    %19 = vector.broadcast %cst_13 : f32 to vector<8x128xf32>
    %20 = arith.mulf %19, %18 : vector<8x128xf32>
    %21 = math.tanh %20 : vector<8x128xf32>
    %cst_14 = arith.constant 5.000000e-01 : f32
    %22 = vector.broadcast %cst_14 : f32 to vector<8x128xf32>
    %23 = arith.mulf %22, %21 : vector<8x128xf32>
    %cst_15 = arith.constant 5.000000e-01 : f32
    %24 = vector.broadcast %cst_15 : f32 to vector<8x128xf32>
    %25 = arith.addf %23, %24 : vector<8x128xf32>
    %26 = arith.mulf %18, %25 : vector<8x128xf32>
    %c0_16 = arith.constant 0 : index
    %c0_17 = arith.constant 0 : index
    %27 = vector.load %arg6[%c0_16, %c0_17] : memref<128x128xf32, #tpu.memory_space<vmem>>, vector<128x128xf32>
    %cst_18 = arith.constant dense<0.000000e+00> : vector<8x128xf32>
    %28 = tpu.matmul %26, %27, %cst_18 {dimension_numbers = #tpu.dot_dimension_numbers<[1], [0], [0], [1], [0, 0, 1, 1], [], []>} : vector<8x128xf32>, vector<128x128xf32>, vector<8x128xf32> -> vector<8x128xf32>
    %c0_19 = arith.constant 0 : index
    %c0_20 = arith.constant 0 : index
    %29 = vector.load %arg7[%c0_19, %c0_20] : memref<1x128xf32, #tpu.memory_space<vmem>>, vector<1x128xf32>
    %30 = vector.broadcast %29 : vector<1x128xf32> to vector<8x128xf32>
    %31 = arith.addf %28, %30 : vector<8x128xf32>
    %c0_21 = arith.constant 0 : index
    %c0_22 = arith.constant 0 : index
    %32 = vector.load %arg8[%c0_21, %c0_22] : memref<8x128xf32, #tpu.memory_space<vmem>>, vector<8x128xf32>
    tpu.vector_store %arg8[%c0_21, %c0_22], %31 {strides = array<i32>} : memref<8x128xf32, #tpu.memory_space<vmem>>, vector<8x128xf32>,
    return
  }
  func.func @transform_0(%arg0: i32) -> (i32, i32) {
    %c0_i32 = arith.constant 0 : i32
    %c0_i32_0 = arith.constant 0 : i32
    return %arg0, %c0_i32 : i32, i32
  }
  func.func @transform_1(%arg0: i32) -> (i32, i32) {
    %c0_i32 = arith.constant 0 : i32
    %c0_i32_0 = arith.constant 0 : i32
    %c0_i32_1 = arith.constant 0 : i32
    return %c0_i32, %c0_i32_0 : i32, i32
  }
  func.func @transform_2(%arg0: i32) -> (i32, i32) {
    %c0_i32 = arith.constant 0 : i32
    %c0_i32_0 = arith.constant 0 : i32
    %c0_i32_1 = arith.constant 0 : i32
    return %c0_i32, %c0_i32_0 : i32, i32
  }
  func.func @transform_3(%arg0: i32) -> (i32, i32) {
    %c0_i32 = arith.constant 0 : i32
    %c0_i32_0 = arith.constant 0 : i32
    %c0_i32_1 = arith.constant 0 : i32
    return %c0_i32, %c0_i32_0 : i32, i32
  }
  func.func @transform_4(%arg0: i32) -> (i32, i32) {
    %c0_i32 = arith.constant 0 : i32
    %c0_i32_0 = arith.constant 0 : i32
    %c0_i32_1 = arith.constant 0 : i32
    return %c0_i32, %c0_i32_0 : i32, i32
  }
  func.func @transform_5(%arg0: i32) -> (i32, i32) {
    %c0_i32 = arith.constant 0 : i32
    %c0_i32_0 = arith.constant 0 : i32
    %c0_i32_1 = arith.constant 0 : i32
    return %c0_i32, %c0_i32_0 : i32, i32
  }
  func.func @transform_6(%arg0: i32) -> (i32, i32) {
    %c0_i32 = arith.constant 0 : i32
    %c0_i32_0 = arith.constant 0 : i32
    %c0_i32_1 = arith.constant 0 : i32
    return %c0_i32, %c0_i32_0 : i32, i32
  }
  func.func @transform_7(%arg0: i32) -> (i32, i32) {
    %c0_i32 = arith.constant 0 : i32
    %c0_i32_0 = arith.constant 0 : i32
    return %arg0, %c0_i32 : i32, i32
  }
}

</mosaic_0001>

<bundles_post_ra>
// kernel: _mlp_forward_impl.1
= control target key start
LH: loop header
LB: loop body
LE: loop exit
PB: predicated region body
PF: predicated region fallthrough
CT: control target
= control target key end

     0   :  { %12 = vsyncpa [#allocation3], 0  ;;  %s1308_s0 = inlined_call_operand.vmem [shape: f32[16,128], index: 0, kind: input, shape index: {}]   ;;  %s1309_s1 = inlined_call_operand.hbm [shape: f32[128,128], index: 1, kind: input, shape index: {}]   ;;  %s1310_s2 = inlined_call_operand.vmem [shape: f32[1,128], index: 2, kind: input, shape index: {}]   ;;  %s1311_s3 = inlined_call_operand.hbm [shape: f32[128,128], index: 3, kind: input, shape index: {}]   ;;  %s1312_s4 = inlined_call_operand.vmem [shape: f32[1,128], index: 4, kind: input, shape index: {}]   ;;  %s1313_s5 = inlined_call_operand.hbm [shape: f32[128,128], index: 5, kind: input, shape index: {}]   ;;  %s1314_s6 = inlined_call_operand.vmem [shape: f32[1,128], index: 6, kind: input, shape index: {}]   ;;  %s1315_s7 = inlined_call_operand.vmem [shape: f32[16,128], index: 7, kind: output, shape index: {}]  }
   0x1   :  { %13 = vsyncpa [#allocation5], 0  ;;  %s1135_s24 = smov 0  }
   0x2 LB: > { %s1141_s25 = sadd.s32 4294967295, %s1085_s24   ;;  %p695_p0 = scmp.ge.s32.totalorder %s1085_s24, 1  ;;  %s1085_s24 = sphi %s1135_s24, %s19_s24  }
   0x3   : > { %p202_p1 = scmp.lt.s32.totalorder %s1085_s24, 3  ;;  %p1316_p2 = scmp.eq.s32.totalorder %s1141_s25, 0 }
   0x4   : > { %s1087_s27 = smov [#allocation4]   ;;  %s1088_s29 = smov [#allocation2]  }
   0x5   : > { %p1146_p3 = pnand %p695_p0, %p202_p1  ;;  %s230_s28 = sshll.u32 %s1087_s27, 4  ;;  %s231_s28 = int_to_ptr.vmem [resolvable:$true] %s230_s28 }
   0x6   : > { %s214_s30 = sshll.u32 %s1088_s29, 4  ;;  %s1089_s9 = smov [#allocation6]   ;;  %s1158_s30 = int_to_ptr.vmem [resolvable:$true] %s214_s30 }
   0x7   : > { %s1318_s26 = scalar_select %p1146_p3, 1, 0 }
   0x8   : > { %p951_p4 = pneg %p1146_p3  ;;  %s246_s10 = sshll.u32 %s1089_s9, 4  ;;  %s1160_s10 = int_to_ptr.vmem [resolvable:$true] %s246_s10 }
   0x9   : > { %s987_s13 = scalar_lea.hbm %s1311_s3, 2048 }
   0xa   : > { %p1154_p5 = pnand %p1316_p2, %p951_p4  ;;  %p988_p6 = scmp.ne.s32.totalorder %s1311_s3, %s987_s13 }
   0xb   : > { %p994_p10 = scmp.lt.u32.totalorder %s987_s13, %s1311_s3 }
   0xc   : > { %p1170_p7 = pneg %p1154_p5 }
   0xe   : > { %p990_p8 = pnand %p1170_p7, %p988_p6 }
  0x10   : > { %p991_p9 = pneg %p990_p8 }
  0x12   : > { %p996_p11 = pnand %p994_p10, %p991_p9 }
  0x14   : > { %999 = shalt.err (!%p996_p11)
}
  0x15   : > { %s1000_s19 = scalar_lea.vmem %s231_s28, 2048  ;;  %p1008_p1 = scmp.lt.s32.totalorder %s231_s28, %s231_s28 }
  0x16   : > { %p1001_p12 = scmp.ne.s32.totalorder %s231_s28, %s1000_s19  ;;  %p1009_p4 = scmp.lt.s32.totalorder %s1000_s19, %s1000_s19 }
  0x18   : > { %p1003_p13 = pnand %p1001_p12, %p1170_p7  ;;  %p1010_p2 = por %p1009_p4, %p1008_p1 }
  0x1a   : > { %p1004_p0 = pneg %p1003_p13 }
  0x1c   : > { %p1011_p3 = pnand %p1010_p2, %p1004_p0 }
  0x1e   : > { %1014 = shalt.err (!%p1011_p3)
}
  0x1f   : > { %s1090_s20 = smov 128   ;;  %s1091_s21 = smov 8  }
  0x20   : > { %957 = dma.hbm_to_vmem [thread:$0]  (!%p1154_p5), %s1311_s3, 2048, %s231_s28, [#allocation5], %s1090_s20, %s1090_s20, %s1091_s21  }
  0x21   : > { %s1015_s9 = scalar_lea.hbm %s1309_s1, 2048 }
  0x22   : > { %p1016_p2 = scmp.ne.s32.totalorder %s1309_s1, %s1015_s9  ;;  %p1022_p8 = scmp.lt.u32.totalorder %s1015_s9, %s1309_s1 }
  0x24   : > { %p1018_p3 = pnand %p1016_p2, %p1170_p7 }
  0x26   : > { %p1019_p6 = pneg %p1018_p3 }
  0x28   : > { %p1024_p9 = pnand %p1022_p8, %p1019_p6 }
  0x2a   : > { %1027 = shalt.err (!%p1024_p9)
}
  0x2b   : > { %s1028_s28 = scalar_lea.vmem %s1158_s30, 2048  ;;  %p1036_p13 = scmp.lt.s32.totalorder %s1158_s30, %s1158_s30 }
  0x2c   : > { %p1029_p10 = scmp.ne.s32.totalorder %s1158_s30, %s1028_s28  ;;  %p1037_p0 = scmp.lt.s32.totalorder %s1028_s28, %s1028_s28 }
  0x2e   : > { %p1031_p11 = pnand %p1029_p10, %p1170_p7  ;;  %p1038_p1 = por %p1037_p0, %p1036_p13 }
  0x30   : > { %p1032_p12 = pneg %p1031_p11 }
  0x32   : > { %p1039_p4 = pnand %p1038_p1, %p1032_p12 }
  0x34   : > { %1042 = shalt.err (!%p1039_p4)
}
  0x35   : > { %954 = dma.hbm_to_vmem [thread:$0]  (!%p1154_p5), %s1309_s1, 2048, %s1158_s30, [#allocation3], %s1090_s20, %s1090_s20, %s1091_s21  }
  0x36   : > { %s1043_s22 = scalar_lea.hbm %s1313_s5, 2048 }
  0x37   : > { %p1044_p2 = scmp.ne.s32.totalorder %s1313_s5, %s1043_s22  ;;  %p1050_p8 = scmp.lt.u32.totalorder %s1043_s22, %s1313_s5 }
  0x39   : > { %p1046_p3 = pnand %p1044_p2, %p1170_p7 }
  0x3b   : > { %p1047_p6 = pneg %p1046_p3 }
  0x3d   : > { %p1052_p9 = pnand %p1050_p8, %p1047_p6 }
  0x3f   : > { %1055 = shalt.err (!%p1052_p9)
}
  0x40   : > { %s1056_s30 = scalar_lea.vmem %s1160_s10, 2048  ;;  %p1064_p13 = scmp.lt.s32.totalorder %s1160_s10, %s1160_s10 }
  0x41   : > { %p1057_p10 = scmp.ne.s32.totalorder %s1160_s10, %s1056_s30  ;;  %p1065_p0 = scmp.lt.s32.totalorder %s1056_s30, %s1056_s30 }
  0x43   : > { %p1059_p11 = pnand %p1057_p10, %p1170_p7  ;;  %p1066_p1 = por %p1065_p0, %p1064_p13 }
  0x45   : > { %p1060_p12 = pneg %p1059_p11 }
  0x47   : > { %p1067_p4 = pnand %p1066_p1, %p1060_p12 }
  0x49   : > { %1070 = shalt.err (!%p1067_p4)
}
  0x4a   : > { %960 = dma.hbm_to_vmem [thread:$0]  (!%p1154_p5), %s1313_s5, 2048, %s1160_s10, [#allocation5], %s1090_s20, %s1090_s20, %s1091_s21  }
  0x4b   : > { %p1321_p2 = scmp.ne.s32.totalorder %s1318_s26, 0 }
  0x4c   : > { %p1322_p7 = scmp.eq.s32.totalorder (!%p1321_p2), %s1141_s25, 0 }
  0x4d   : > { %272 = sbr.rel (%p1321_p2) target bundleno = 805 (0x325), region = 48 }
  0x54   : > { %1076 = dma.done.wait (%p1322_p7), [#allocation3], 2048   ;;  %p1323_p3 = pmov %p1322_p7 }
  0x56   : > { %1078 = vsyncadd (%p1323_p3), [#allocation3], 4294965248  ;;  %p1324_p6 = pmov %p1323_p3 }
  0x57   : > { %p1325_p8 = pmov %p1323_p3 }
  0x58   : > { %1080 = dma.done.wait (%p1324_p6), [#allocation5], 4096  }
  0x59   : > { %1082 = vsyncadd (%p1325_p8), [#allocation5], 4294963200  ;;  %v1092_v0 = vmov 0.0|0.0   ;;  %vm1093_vm0 = vmmov 0   ;;  %v1094_v1 = vmov 0.0   ;;  %v319_v2 = vld [vmem:[#allocation2] sm:$0xff] }
  0x5a   : > { %867 = vmatprep.subr.bf16.mxu0 %v1092_v0  ;;  %794 = vmatprep.mubr.msk.f32.mxu0 %vm1093_vm0, %v1094_v1  ;;  %v320_v3 = vld [vmem:[#allocation2 + $0x8] sm:$0xff]  ;;  %v321_v4 = vld [vmem:[#allocation2 + $0x10] sm:$0xff]  ;;  %v322_v6 = vld [vmem:[#allocation2 + $0x18] sm:$0xff]  ;;  %p310_p5 = scmp.lt.s32.totalorder %s1141_s25, 1 }
  0x5b   : > { %891 = vmatprep.subr.bf16.mxu1 %v1092_v0  ;;  %829 = vmatprep.mubr.msk.f32.mxu1 %vm1093_vm0, %v1094_v1  ;;  %v868_v5 = vpack.c.bf16 %v320_v3, %v319_v2  ;;  %v871_v7 = vpack.c.bf16 %v322_v6, %v321_v4  ;;  %v323_v8 = vld [vmem:[#allocation2 + $0x20] sm:$0xff]  ;;  %v324_v9 = vld [vmem:[#allocation2 + $0x28] sm:$0xff]  ;;  %v419_v12 = vld [vmem:[#allocation4 + $0x10] sm:$0xff] }
  0x5c   : > { %v417_v10 = vld [vmem:[#allocation4] sm:$0xff]  ;;  %v418_v11 = vld [vmem:[#allocation4 + $0x8] sm:$0xff]  ;;  %v420_v13 = vld [vmem:[#allocation4 + $0x18] sm:$0xff]  ;;  %v874_v14 = vpack.c.bf16 %v324_v9, %v323_v8  ;;  %s1327_s25 = smov (!%p310_p5, %s1141_s25), 1 }
  0x5d   : > { %869 = vmatpush3.bf16.msra.mxu0 %v868_v5  ;;  %v892_v15 = vpack.c.bf16 %v418_v11, %v417_v10  ;;  %v325_v16 = vld [vmem:[#allocation2 + $0x30] sm:$0xff]  ;;  %v326_v17 = vld [vmem:[#allocation2 + $0x38] sm:$0xff]  ;;  %v895_v18 = vpack.c.bf16 %v420_v13, %v419_v12  ;;  %v421_v19 = vld [vmem:[#allocation4 + $0x20] sm:$0xff]  ;;  %s704_s26 = sshll.u32 %s1327_s25, 3 }
  0x5e   : > { %870 = vmatprep.subr.bf16.mxu0 %v1092_v0  ;;  %v422_v20 = vld [vmem:[#allocation4 + $0x28] sm:$0xff]  ;;  %v877_v21 = vpack.c.bf16 %v326_v17, %v325_v16  ;;  %v327_v22 = vld [vmem:[#allocation2 + $0x40] sm:$0xff]  ;;  %v329_v26 = vld [vmem:[#allocation2 + $0x50] sm:$0xff]  ;;  %s313_s16 = scalar_lea.vmem %s1308_s0, %s704_s26  ;;  %s317_s19 = scalar_lea.vmem %s1315_s7, %s704_s26 }
  0x5f   : > { %893 = vmatpush3.bf16.msra.mxu1 %v892_v15  ;;  %v328_v23 = vld [vmem:[#allocation2 + $0x48] sm:$0xff]  ;;  %v898_v24 = vpack.c.bf16 %v422_v20, %v421_v19  ;;  %v330_v27 = vld [vmem:[#allocation2 + $0x58] sm:$0xff]  ;;  %v331_v29 = vld [vmem:[#allocation2 + $0x60] sm:$0xff] }
  0x60   : > { %894 = vmatprep.subr.bf16.mxu1 %v1092_v0  ;;  %v880_v25 = vpack.c.bf16 %v328_v23, %v327_v22  ;;  %v883_v28 = vpack.c.bf16 %v330_v27, %v329_v26  ;;  %v332_v30 = vld [vmem:[#allocation2 + $0x68] sm:$0xff]  ;;  %v333_v32 = vld [vmem:[#allocation2 + $0x70] sm:$0xff]  ;;  %v334_v33 = vld [vmem:[#allocation2 + $0x78] sm:$0xff] }
  0x61   : > { %872 = vmatpush3.bf16.msra.mxu0 %v871_v7  ;;  %v886_v31 = vpack.c.bf16 %v332_v30, %v331_v29  ;;  %v889_v34 = vpack.c.bf16 %v334_v33, %v333_v32  ;;  %v318_v35 = vld [vmem:[%s313_s16] sm:$0xff]  ;;  %v423_v36 = vld [vmem:[#allocation4 + $0x30] sm:$0xff]  ;;  %v424_v37 = vld [vmem:[#allocation4 + $0x38] sm:$0xff] }
  0x62   : > { %873 = vmatprep.subr.bf16.mxu0 %v1092_v0  ;;  %v901_v38 = vpack.c.bf16 %v424_v37, %v423_v36  ;;  %v425_v39 = vld [vmem:[#allocation4 + $0x40] sm:$0xff]  ;;  %v426_v40 = vld [vmem:[#allocation4 + $0x48] sm:$0xff]  ;;  %v427_v42 = vld [vmem:[#allocation4 + $0x50] sm:$0xff] }
  0x63   : > { %896 = vmatpush3.bf16.msra.mxu1 %v895_v18  ;;  %v904_v41 = vpack.c.bf16 %v426_v40, %v425_v39  ;;  %v428_v43 = vld [vmem:[#allocation4 + $0x58] sm:$0xff]  ;;  %v429_v45 = vld [vmem:[#allocation4 + $0x60] sm:$0xff]  ;;  %v430_v46 = vld [vmem:[#allocation4 + $0x68] sm:$0xff] }
  0x64   : > { %897 = vmatprep.subr.bf16.mxu1 %v1092_v0  ;;  %v907_v44 = vpack.c.bf16 %v428_v43, %v427_v42  ;;  %v910_v47 = vpack.c.bf16 %v430_v46, %v429_v45  ;;  %v431_v48 = vld [vmem:[#allocation4 + $0x70] sm:$0xff]  ;;  %v432_v49 = vld [vmem:[#allocation4 + $0x78] sm:$0xff]  ;;  %v515_v51 = vld [vmem:[#allocation6] sm:$0xff] }
  0x65   : > { %875 = vmatpush3.bf16.msra.mxu0 %v874_v14  ;;  %v913_v50 = vpack.c.bf16 %v432_v49, %v431_v48  ;;  %v516_v52 = vld [vmem:[#allocation6 + $0x8] sm:$0xff]  ;;  %v517_v53 = vld [vmem:[#allocation6 + $0x10] sm:$0xff]  ;;  %v518_v55 = vld [vmem:[#allocation6 + $0x18] sm:$0xff] }
  0x66   : > { %876 = vmatprep.subr.bf16.mxu0 %v1092_v0  ;;  %v916_v54 = vpack.c.bf16 %v516_v52, %v515_v51  ;;  %v919_v56 = vpack.c.bf16 %v518_v55, %v517_v53  ;;  %v519_v57 = vld [vmem:[#allocation6 + $0x20] sm:$0xff]  ;;  %v520_v58 = vld [vmem:[#allocation6 + $0x28] sm:$0xff]  ;;  %v521_v6 = vld [vmem:[#allocation6 + $0x30] sm:$0xff] }
  0x67   : > { %899 = vmatpush3.bf16.msra.mxu1 %v898_v24  ;;  %v922_v59 = vpack.c.bf16 %v520_v58, %v519_v57  ;;  %v706_v60 = vld [vmem:[%s1310_s2] ss:$0 sm:$0xff]  ;;  %v522_v7 = vld [vmem:[#allocation6 + $0x38] sm:$0xff]  ;;  %v524_v10 = vld [vmem:[#allocation6 + $0x48] sm:$0xff] }
  0x68   : > { %900 = vmatprep.subr.bf16.mxu1 %v1092_v0  ;;  %v925_v8 = vpack.c.bf16 %v522_v7, %v521_v6  ;;  %v523_v9 = vld [vmem:[#allocation6 + $0x40] sm:$0xff]  ;;  %v525_v12 = vld [vmem:[#allocation6 + $0x50] sm:$0xff]  ;;  %v526_v13 = vld [vmem:[#allocation6 + $0x58] sm:$0xff] }
  0x69   : > { %878 = vmatpush3.bf16.msra.mxu0 %v877_v21  ;;  %v928_v11 = vpack.c.bf16 %v524_v10, %v523_v9  ;;  %v931_v14 = vpack.c.bf16 %v526_v13, %v525_v12  ;;  %v527_v15 = vld [vmem:[#allocation6 + $0x60] sm:$0xff]  ;;  %v528_v16 = vld [vmem:[#allocation6 + $0x68] sm:$0xff]  ;;  %v529_v18 = vld [vmem:[#allocation6 + $0x70] sm:$0xff] }
  0x6a   : > { %879 = vmatprep.subr.bf16.mxu0 %v1092_v0  ;;  %v934_v17 = vpack.c.bf16 %v528_v16, %v527_v15  ;;  %v530_v19 = vld [vmem:[#allocation6 + $0x78] sm:$0xff]  ;;  %v707_v21 = vld [vmem:[%s1312_s4] ss:$0 sm:$0xff] }
  0x6b   : > { %902 = vmatpush3.bf16.msra.mxu1 %v901_v38  ;;  %v937_v20 = vpack.c.bf16 %v530_v19, %v529_v18 }
  0x6c   : > { %903 = vmatprep.subr.bf16.mxu1 %v1092_v0 }
  0x6d   : > { %881 = vmatpush3.bf16.msra.mxu0 %v880_v25 }
  0x6e   : > { %882 = vmatprep.subr.bf16.mxu0 %v1092_v0 }
  0x6f   : > { %905 = vmatpush3.bf16.msra.mxu1 %v904_v41 }
  0x70   : > { %906 = vmatprep.subr.bf16.mxu1 %v1092_v0 }
  0x71   : > { %884 = vmatpush3.bf16.msra.mxu0 %v883_v28 }
  0x72   : > { %885 = vmatprep.subr.bf16.mxu0 %v1092_v0 }
  0x73   : > { %908 = vmatpush3.bf16.msra.mxu1 %v907_v44 }
  0x74   : > { %909 = vmatprep.subr.bf16.mxu1 %v1092_v0 }
  0x75   : > { %887 = vmatpush3.bf16.msra.mxu0 %v886_v31 }
  0x76   : > { %888 = vmatprep.subr.bf16.mxu0 %v1092_v0 }
  0x77   : > { %911 = vmatpush3.bf16.msra.mxu1 %v910_v47 }
  0x78   : > { %912 = vmatprep.subr.bf16.mxu1 %v1092_v0 }
  0x79   : > { %890 = vmatpush3.bf16.msra.mxu0 %v889_v34 }
  0x7a   : > { %915 = vmatprep.subr.bf16.mxu0 %v1092_v0 }
  0x7b   : > { %914 = vmatpush3.bf16.msra.mxu1 %v913_v50 }
  0x7c   : > { %795 = vmatmul.mubr.f32.vlgmr.msra.gmra.mrb[0].mxu0 %v318_v35 }
  0x7d   : > { %864 = vmatprep.mubr.msk.f32.mxu0 %vm1093_vm0, %v1094_v1  ;;  %917 = vmatpush3.bf16.msra.mxu0 %v916_v54 }
  0x7e   : > { %918 = vmatprep.subr.bf16.mxu0 %v1092_v0 }
  0x81   : > { %920 = vmatpush3.bf16.msra.mxu0 %v919_v56 }
  0x82   : > { %921 = vmatprep.subr.bf16.mxu0 %v1092_v0 }
  0x85   : > { %923 = vmatpush3.bf16.msra.mxu0 %v922_v59 }
  0x86   : > { %924 = vmatprep.subr.bf16.mxu0 %v1092_v0 }
  0x89   : > { %926 = vmatpush3.bf16.msra.mxu0 %v925_v8 }
  0x8a   : > { %927 = vmatprep.subr.bf16.mxu0 %v1092_v0 }
  0x8d   : > { %929 = vmatpush3.bf16.msra.mxu0 %v928_v11 }
  0x8e   : > { %930 = vmatprep.subr.bf16.mxu0 %v1092_v0 }
  0x91   : > { %932 = vmatpush3.bf16.msra.mxu0 %v931_v14 }
  0x92   : > { %933 = vmatprep.subr.bf16.mxu0 %v1092_v0 }
  0x95   : > { %935 = vmatpush3.bf16.msra.mxu0 %v934_v17 }
  0x96   : > { %936 = vmatprep.subr.bf16.mxu0 %v1092_v0  ;;  %v708_v0 = vld [vmem:[%s1314_s6] ss:$0 sm:$0xff] }
  0x99   : > { %938 = vmatpush3.bf16.msra.mxu0 %v937_v20 }
 0x14f   : > { %v408_v61 = vpop.f32.mrb[0].mxu0 }
 0x150   : > { %v409_v62 = vadd.f32 %v706_v60, %v408_v61  ;;  %v796_v63 = vpop.f32.mrb[1].mxu0 }
 0x152   : > { %v412_v1 = vmul.f32 0.5, %v409_v62 }
 0x154   : > { %983 = vtanh.f32 %v412_v1 }
 0x15e   : > { %v984_v2 = vpop.eup %983 }
 0x15f   : > { %v414_v3 = vmul.f32 0.5, %v984_v2 }
 0x161   : > { %v415_v4 = vadd.f32 0.5, %v414_v3 }
 0x163   : > { %v416_v5 = vmul.f32 %v415_v4, %v409_v62 }
 0x165   : > { %830 = vmatmul.mubr.f32.vlgmr.msra.gmra.mrb[0].mxu1 %v416_v5 }
 0x238   : > { %v506_v22 = vpop.f32.mrb[0].mxu1 }
 0x239   : > { %v507_v23 = vadd.f32 %v707_v21, %v506_v22  ;;  %v831_v24 = vpop.f32.mrb[1].mxu1 }
 0x23b   : > { %v510_v25 = vmul.f32 0.5, %v507_v23 }
 0x23d   : > { %985 = vtanh.f32 %v510_v25 }
 0x247   : > { %v986_v26 = vpop.eup %985 }
 0x248   : > { %v512_v27 = vmul.f32 0.5, %v986_v26 }
 0x24a   : > { %v513_v28 = vadd.f32 0.5, %v512_v27 }
 0x24c   : > { %v514_v29 = vmul.f32 %v513_v28, %v507_v23 }
 0x24e   : > { %865 = vmatmul.mubr.f32.vlgmr.msra.gmra.mrb[2].mxu0 %v514_v29 }
 0x321   : > { %v604_v30 = vpop.f32.mrb[2].mxu0 }
 0x322   : > { %v605_v31 = vadd.f32 %v708_v0, %v604_v30  ;;  %v866_v32 = vpop.f32.mrb[3].mxu0 }
 0x324   : > { %608 = vst [vmem:[%s317_s19] sm:$0xff] %v605_v31 }
 0x325 PF: > { %s19_s24 = sadd.s32 1, %s1085_s24  }
 0x326   : > { %p16_p9 = scmp.ge.s32.totalorder %s19_s24, 4  }
 0x328   :  { %18 = sbr.rel (!%p16_p9) target bundleno = 2 (0x2), region = 91 }
 0x32f   :  { %628 = vsyncpa [#allocation3], 1 }
 0x330   :  { %630 = vsyncpa [#allocation3 + $0x1], 1 }
 0x331   :  { %631 = vsyncpa [#allocation5], 1 }

</bundles_post_ra>
